<compile_context>
chip_gen: v6e
topology: v6e:2x2x1
jax: 0.10.0
libtpu: 0.0.40
codegen_flags: <defaults>
</compile_context>

<pallas_src>
import functools
import math

import jax
import jax.numpy as jnp
from jax.experimental import pallas as pl
from jax.experimental.pallas import tpu as pltpu


def _vmem_limit_bytes(default=32 * 1024 * 1024):
    """Generation-aware scoped-VMEM budget (~60% of physical, capped at 96 MiB)."""
    try:
        cap = pltpu.get_tpu_info().vmem_capacity_bytes
        return min(int(cap * 0.6), 96 * 1024 * 1024)
    except Exception:
        return default


def _pick_tile(dim, target, multiple):
    """Largest divisor of `dim` that is <= target and a multiple of `multiple`.

    Falls back to the full dim only if no legal divisor exists (keeps the (8,128)
    tiling rule satisfied without ragged tiles feeding the softmax)."""
    for cand in range(min(dim, target), multiple - 1, -1):
        if dim % cand == 0 and cand % multiple == 0:
            return cand
    return dim


# --------------------------------------------------------------------------------------
# Linear projection kernel: y = x @ W^T + b  (row-tiled, weight resident in VMEM)
# --------------------------------------------------------------------------------------
def _linear_kernel(x_ref, w_ref, b_ref, o_ref, *, compute_dtype):
    x = x_ref[...].astype(compute_dtype)
    w = w_ref[...].astype(compute_dtype)
    y = jnp.dot(x, w, preferred_element_type=jnp.float32) + b_ref[...]
    o_ref[...] = y.astype(o_ref.dtype)


def pallas_linear(x, w_t, b, *, row_tile=1024, compute_dtype=jnp.float32):
    """x: [N, Din], w_t: [Din, Dout] (already transposed), b: [Dout]."""
    n, din = x.shape
    dout = w_t.shape[1]
    # row_tile is a multiple of 8; a ragged last tile is handled by masked writes.
    tn = n if n <= row_tile else row_tile
    return pl.pallas_call(
        functools.partial(_linear_kernel, compute_dtype=compute_dtype),
        out_shape=jax.ShapeDtypeStruct((n, dout), x.dtype),
        grid=(pl.cdiv(n, tn),),
        in_specs=[
            pl.BlockSpec((tn, din), lambda i: (i, 0)),
            pl.BlockSpec((din, dout), lambda i: (0, 0)),  # weight resident
            pl.BlockSpec((1, dout), lambda i: (0, 0)),    # bias resident
        ],
        out_specs=pl.BlockSpec((tn, dout), lambda i: (i, 0)),
        compiler_params=pltpu.CompilerParams(
            dimension_semantics=("parallel",),
            vmem_limit_bytes=_vmem_limit_bytes(),
        ),
    )(x, w_t, b.reshape(1, dout))


# --------------------------------------------------------------------------------------
# Attention kernel: one (batch, q-tile) per program, online softmax over KV tiles,
# pre-transposed K (no in-kernel transpose), lane-dense accumulator, fused Wo.
# --------------------------------------------------------------------------------------
def _attn_kernel(q_ref, kT_ref, v_ref, bias_ref, wo_ref, bo_ref, o_ref,
                 m_ref, l_ref, acc_ref, *, heads, d_k, compute_dtype):
    t = pl.program_id(2)
    qt = acc_ref.shape[0]

    @pl.when(t == 0)
    def _init():
        m_ref[...] = jnp.full(m_ref.shape, -jnp.inf, dtype=m_ref.dtype)
        l_ref[...] = jnp.zeros(l_ref.shape, dtype=l_ref.dtype)
        acc_ref[...] = jnp.zeros(acc_ref.shape, dtype=acc_ref.dtype)

    # Online-softmax update per head; all slices are static, loads are per-chunk
    # (no full (qt, d_model) value materialisation -> no vreg spills).
    for h in range(heads):
        lo = h * d_k
        qh = q_ref[0, :, lo:lo + d_k].astype(compute_dtype)    # [qt, d_k]
        kTh = kT_ref[0, lo:lo + d_k, :].astype(compute_dtype)  # [d_k, kt]
        vh = v_ref[0, :, lo:lo + d_k].astype(compute_dtype)    # [kt, d_k]
        # Standard MXU form (contraction on the sublane axis of the rhs); K was
        # pre-transposed in the wrapper, so no per-tile XLU transpose here.
        # 1/sqrt(d_k) is pre-folded into Wq/bq -> no per-score multiply.
        s = jnp.dot(qh, kTh, preferred_element_type=jnp.float32)  # [qt, kt]
        s = s + bias_ref[h]

        m_prev = m_ref[:, h:h + 1]                                 # [qt, 1]
        m_new = jnp.maximum(m_prev, jnp.max(s, axis=-1, keepdims=True))
        alpha = jnp.exp(m_prev - m_new)
        p = jnp.exp(s - m_new)
        l_ref[:, h:h + 1] = alpha * l_ref[:, h:h + 1] + jnp.sum(p, axis=-1, keepdims=True)
        pv = jnp.dot(p.astype(compute_dtype), vh, preferred_element_type=jnp.float32)
        acc_ref[:, lo:lo + d_k] = alpha * acc_ref[:, lo:lo + d_k] + pv
        m_ref[:, h:h + 1] = m_new

    # Finalize: normalise (EUP reciprocal), fuse the to_out projection (Wo resident),
    # single lane-dense [qt, d_model] store.
    @pl.when(t == pl.num_programs(2) - 1)
    def _finalize():
        inv = pl.reciprocal(l_ref[...], approx=True)               # [qt, heads]
        norm = jnp.concatenate(
            [jnp.broadcast_to(inv[:, h:h + 1], (qt, d_k)) for h in range(heads)],
            axis=-1)                                               # [qt, d_model]
        attn = acc_ref[...] * norm
        y = jnp.dot(attn.astype(compute_dtype), wo_ref[...].astype(compute_dtype),
                    preferred_element_type=jnp.float32) + bo_ref[...]
        o_ref[0] = y.astype(o_ref.dtype)


def pallas_attention(qb, kTb, vb, bias, wo_t, bo, *, heads,
                     q_tile=128, kv_tile=256, compute_dtype=jnp.float32):
    """qb: [B, QL, D], kTb: [B, D, KL] (K pre-transposed), vb: [B, KL, D],
    bias: [H, QL, KL].  Returns [B, QL, D] with the to_out projection applied."""
    batch, q_len, d_model = qb.shape
    k_len = vb.shape[1]
    d_k = d_model // heads

    qt = _pick_tile(q_len, q_tile, 8)
    kt = _pick_tile(k_len, kv_tile, 128)
    grid = (batch, q_len // qt, k_len // kt)

    kernel = functools.partial(_attn_kernel, heads=heads, d_k=d_k,
                               compute_dtype=compute_dtype)
    return pl.pallas_call(
        kernel,
        out_shape=jax.ShapeDtypeStruct((batch, q_len, d_model), qb.dtype),
        grid=grid,
        in_specs=[
            pl.BlockSpec((1, qt, d_model), lambda b, i, t: (b, i, 0)),  # q resident over t
            pl.BlockSpec((1, d_model, kt), lambda b, i, t: (b, 0, t)),  # K^T streamed
            pl.BlockSpec((1, kt, d_model), lambda b, i, t: (b, t, 0)),  # V streamed
            pl.BlockSpec((heads, qt, kt), lambda b, i, t: (0, i, t)),   # rel-pos bias
            pl.BlockSpec((d_model, d_model), lambda b, i, t: (0, 0)),   # Wo^T resident
            pl.BlockSpec((1, d_model), lambda b, i, t: (0, 0)),         # bo resident
        ],
        out_specs=pl.BlockSpec((1, qt, d_model), lambda b, i, t: (b, i, 0)),
        scratch_shapes=[
            pltpu.VMEM((qt, heads), jnp.float32),    # running max (lane-packed per head)
            pltpu.VMEM((qt, heads), jnp.float32),    # running sum (lane-packed per head)
            pltpu.VMEM((qt, d_model), jnp.float32),  # PV accumulator (heads on lanes)
        ],
        compiler_params=pltpu.CompilerParams(
            dimension_semantics=("parallel", "parallel", "arbitrary"),
            vmem_limit_bytes=_vmem_limit_bytes(),
        ),
    )(qb, kTb, vb, bias, wo_t, bo.reshape(1, d_model))


# --------------------------------------------------------------------------------------
# Module wrapper
# --------------------------------------------------------------------------------------
def relative_mha_forward(params, query, key, value, *, compute_dtype=jnp.float32):
    """query/key/value: [seq_len, batch, d_model] (PyTorch module convention)."""
    q_len, batch, d_model = query.shape
    k_len = key.shape[0]
    rel_table = params["rel_table"]            # [2*max_len - 1, heads]
    heads = rel_table.shape[1]
    max_len = (rel_table.shape[0] + 1) // 2
    d_k = d_model // heads
    scale = 1.0 / math.sqrt(d_k)

    # Fold the attention scale into the Q projection weights/bias.
    wq_t = (params["wq"] * scale).T
    bq = params["bq"] * scale

    # Q/K/V projections on flattened [L*B, d_model] rows (contiguous reshape).
    q2 = pallas_linear(query.reshape(q_len * batch, d_model), wq_t, bq,
                       compute_dtype=compute_dtype)
    k2 = pallas_linear(key.reshape(k_len * batch, d_model), params["wk"].T, params["bk"],
                       compute_dtype=compute_dtype)
    v2 = pallas_linear(value.reshape(k_len * batch, d_model), params["wv"].T, params["bv"],
                       compute_dtype=compute_dtype)

    # One-time layout changes (cheap O(L*B*D) XLA transposes); K is pre-transposed so
    # the score matmul needs no in-kernel transpose.
    qb = q2.reshape(q_len, batch, d_model).transpose(1, 0, 2)    # [B, QL, D]
    kTb = k2.reshape(k_len, batch, d_model).transpose(1, 2, 0)   # [B, D, KL]
    vb = v2.reshape(k_len, batch, d_model).transpose(1, 0, 2)    # [B, KL, D]

    # Relative position bias, computed once: [H, QL, KL].
    dist = jnp.arange(q_len)[:, None] - jnp.arange(k_len)[None, :] + (max_len - 1)
    dist = jnp.clip(dist, 0, 2 * max_len - 2)
    bias = jnp.transpose(rel_table[dist], (2, 0, 1)).astype(jnp.float32)

    # Attention + fused output projection -> [B, QL, D] -> module layout [QL, B, D].
    out_b = pallas_attention(qb, kTb, vb, bias, params["wo"].T, params["bo"],
                             heads=heads, compute_dtype=compute_dtype)
    return out_b.transpose(1, 0, 2)


# --------------------------------------------------------------------------------------
# Pure-JAX reference (mirrors the PyTorch forward in eval mode)
# --------------------------------------------------------------------------------------
def relative_mha_reference(params, query, key, value):
    q_len, batch, d_model = query.shape
    k_len = key.shape[0]
    rel_table = params["rel_table"]
    heads = rel_table.shape[1]
    max_len = (rel_table.shape[0] + 1) // 2
    d_k = d_model // heads
    scale = 1.0 / math.sqrt(d_k)

    q = (query @ params["wq"].T + params["bq"]).reshape(q_len, batch, heads, d_k)
    k = (key @ params["wk"].T + params["bk"]).reshape(k_len, batch, heads, d_k)
    v = (value @ params["wv"].T + params["bv"]).reshape(k_len, batch, heads, d_k)
    scores = jnp.einsum("qbhd,kbhd->bhqk", q, k) * scale
    dist = jnp.arange(q_len)[:, None] - jnp.arange(k_len)[None, :] + (max_len - 1)
    dist = jnp.clip(dist, 0, 2 * max_len - 2)
    bias = jnp.transpose(rel_table[dist], (2, 0, 1))[None]
    attn = jax.nn.softmax(scores + bias, axis=-1)
    out = jnp.einsum("bhqk,kbhd->qbhd", attn, v).reshape(q_len, batch, d_model)
    return out @ params["wo"].T + params["bo"]


# --------------------------------------------------------------------------------------
# Main
# --------------------------------------------------------------------------------------
if __name__ == "__main__":
    d_model, heads, max_len = 32, 4, 16
    q_len, k_len, batch = 8, 8, 2

    root = jax.random.PRNGKey(0)
    keys = jax.random.split(root, 10)

    params = {
        "wq": 0.05 * jax.random.normal(keys[0], (d_model, d_model), jnp.float32),
        "bq": 0.01 * jax.random.normal(keys[1], (d_model,), jnp.float32),
        "wk": 0.05 * jax.random.normal(keys[2], (d_model, d_model), jnp.float32),
        "bk": 0.01 * jax.random.normal(keys[3], (d_model,), jnp.float32),
        "wv": 0.05 * jax.random.normal(keys[4], (d_model, d_model), jnp.float32),
        "bv": 0.01 * jax.random.normal(keys[5], (d_model,), jnp.float32),
        "wo": 0.05 * jax.random.normal(keys[6], (d_model, d_model), jnp.float32),
        "bo": 0.01 * jax.random.normal(keys[7], (d_model,), jnp.float32),
        "rel_table": jax.random.normal(keys[8], (2 * max_len - 1, heads), jnp.float32),
    }

    in_keys = jax.random.split(keys[9], 3)
    query = jax.random.normal(in_keys[0], (q_len, batch, d_model), jnp.float32)
    key = jax.random.normal(in_keys[1], (k_len, batch, d_model), jnp.float32)
    value = jax.random.normal(in_keys[2], (k_len, batch, d_model), jnp.float32)

    out = relative_mha_forward(params, query, key, value)
    out = jax.block_until_ready(out)

    ref = jax.block_until_ready(relative_mha_reference(params, query, key, value))
    assert out.shape == (q_len, batch, d_model)
    max_err = jnp.max(jnp.abs(out - ref))
    # Tolerance allows for the online-softmax reordering and the EUP approx reciprocal.
    assert jnp.allclose(out, ref, rtol=5e-3, atol=5e-3), f"mismatch vs reference ({max_err})"

    print("KERNEL_OK")
</pallas_src>

<mosaic_0001>
module attributes {stable_mosaic.version = 11 : i64} {
  func.func @_linear_kernel(%arg0: i32, %arg1: memref<16x32xf32, #tpu.memory_space<vmem>>, %arg2: memref<32x32xf32, #tpu.memory_space<vmem>>, %arg3: memref<1x32xf32, #tpu.memory_space<vmem>>, %arg4: memref<16x32xf32, #tpu.memory_space<vmem>>) attributes {dimension_semantics = [#tpu.dimension_semantics<parallel>], iteration_bounds = array<i64: 1>, scalar_prefetch = 0 : i64, scratch_operands = 0 : i64, tpu.core_type = #tpu.core_type<tc>, window_params = [{transform_indices = @transform_0, window_bounds = array<i64: 16, 32>}, {pipeline_mode = #tpu.pipeline_mode<synchronous>, transform_indices = @transform_1, window_bounds = array<i64: 32, 32>}, {pipeline_mode = #tpu.pipeline_mode<synchronous>, transform_indices = @transform_2, window_bounds = array<i64: 1, 32>}, {transform_indices = @transform_3, window_bounds = array<i64: 16, 32>}]} {
    %c0 = arith.constant 0 : index
    %c0_0 = arith.constant 0 : index
    %0 = vector.load %arg1[%c0, %c0_0] : memref<16x32xf32, #tpu.memory_space<vmem>>, vector<16x32xf32>
    %c0_1 = arith.constant 0 : index
    %c0_2 = arith.constant 0 : index
    %1 = vector.load %arg2[%c0_1, %c0_2] : memref<32x32xf32, #tpu.memory_space<vmem>>, vector<32x32xf32>
    %cst = arith.constant dense<0.000000e+00> : vector<16x32xf32>
    %2 = tpu.matmul %0, %1, %cst {dimension_numbers = #tpu.dot_dimension_numbers<[1], [0], [0], [1], [0, 0, 1, 1], [], []>} : vector<16x32xf32>, vector<32x32xf32>, vector<16x32xf32> -> vector<16x32xf32>
    %c0_3 = arith.constant 0 : index
    %c0_4 = arith.constant 0 : index
    %3 = vector.load %arg3[%c0_3, %c0_4] : memref<1x32xf32, #tpu.memory_space<vmem>>, vector<1x32xf32>
    %4 = vector.broadcast %3 : vector<1x32xf32> to vector<16x32xf32>
    %5 = arith.addf %2, %4 : vector<16x32xf32>
    %c0_5 = arith.constant 0 : index
    %c0_6 = arith.constant 0 : index
    %6 = vector.load %arg4[%c0_5, %c0_6] : memref<16x32xf32, #tpu.memory_space<vmem>>, vector<16x32xf32>
    tpu.vector_store %arg4[%c0_5, %c0_6], %5 {strides = array<i32>} : memref<16x32xf32, #tpu.memory_space<vmem>>, vector<16x32xf32>,
    return
  }
  func.func @transform_0(%arg0: i32) -> (i32, i32) {
    %c0_i32 = arith.constant 0 : i32
    %c0_i32_0 = arith.constant 0 : i32
    return %arg0, %c0_i32 : i32, i32
  }
  func.func @transform_1(%arg0: i32) -> (i32, i32) {
    %c0_i32 = arith.constant 0 : i32
    %c0_i32_0 = arith.constant 0 : i32
    %c0_i32_1 = arith.constant 0 : i32
    return %c0_i32, %c0_i32_0 : i32, i32
  }
  func.func @transform_2(%arg0: i32) -> (i32, i32) {
    %c0_i32 = arith.constant 0 : i32
    %c0_i32_0 = arith.constant 0 : i32
    %c0_i32_1 = arith.constant 0 : i32
    return %c0_i32, %c0_i32_0 : i32, i32
  }
  func.func @transform_3(%arg0: i32) -> (i32, i32) {
    %c0_i32 = arith.constant 0 : i32
    %c0_i32_0 = arith.constant 0 : i32
    return %arg0, %c0_i32 : i32, i32
  }
}

</mosaic_0001>

<bundles_post_ra>
// kernel: tpu_custom_call.1
= control target key start
LH: loop header
LB: loop body
LE: loop exit
PB: predicated region body
PF: predicated region fallthrough
CT: control target
= control target key end

     0   :  { %8 = vsyncpa [#allocation3], 0  ;;  %s299_s0 = inlined_call_operand.hbm [shape: f32[16,32], index: 0, kind: input, shape index: {}]   ;;  %s300_s1 = inlined_call_operand.hbm [shape: f32[32,32], index: 1, kind: input, shape index: {}]   ;;  %s301_s2 = inlined_call_operand.vmem [shape: f32[1,32], index: 2, kind: input, shape index: {}]   ;;  %s302_s3 = inlined_call_operand.hbm [shape: f32[16,32], index: 3, kind: output, shape index: {}]  }
   0x1   :  { %9 = vsyncpa [#allocation6], 0 }
   0x2   :  { %10 = vsyncpa [#allocation4], 0  ;;  %s249_s12 = smov [#allocation2]  }
   0x3   :  { %s16_s13 = sshll.u32 %s249_s12, 4  ;;  %s17_s13 = int_to_ptr.vmem [resolvable:$true] %s16_s13 }
   0x4   :  { %s191_s14 = scalar_lea.vmem %s17_s13, 256  ;;  %p196_p1 = scmp.lt.s32.totalorder %s17_s13, %s17_s13 }
   0x5   :  { %p192_p0 = scmp.ne.s32.totalorder %s17_s13, %s191_s14  ;;  %p197_p2 = scmp.lt.s32.totalorder %s191_s14, %s191_s14 }
   0x7   :  { %p198_p3 = por %p197_p2, %p196_p1 }
   0x9   :  { %p199_p4 = pnand %p198_p3, %p192_p0 }
   0xb   :  { %202 = shalt.err (!%p199_p4)
}
   0xc   :  { %s250_s15 = smov 128   ;;  %s251_s16 = smov 8  }
   0xd   :  { %22 = dma.hbm_to_vmem [thread:$0]  %s299_s0, 256, %s17_s13, [#allocation3], %s250_s15, %s250_s15, %s251_s16  }
   0xe   :  { %s252_s19 = smov [#allocation5]  }
   0xf   :  { %s28_s20 = sshll.u32 %s252_s19, 4  ;;  %s29_s20 = int_to_ptr.vmem [resolvable:$true] %s28_s20 }
  0x10   :  { %s211_s21 = scalar_lea.vmem %s29_s20, 512  ;;  %p216_p6 = scmp.lt.s32.totalorder %s29_s20, %s29_s20 }
  0x11   :  { %p212_p5 = scmp.ne.s32.totalorder %s29_s20, %s211_s21  ;;  %p217_p7 = scmp.lt.s32.totalorder %s211_s21, %s211_s21 }
  0x13   :  { %p218_p8 = por %p217_p7, %p216_p6 }
  0x15   :  { %p219_p9 = pnand %p218_p8, %p212_p5 }
  0x17   :  { %222 = shalt.err (!%p219_p9)
}
  0x18   :  { %34 = dma.hbm_to_vmem [thread:$0]  %s300_s1, 512, %s29_s20, [#allocation6], %s250_s15, %s250_s15, %s251_s16  }
  0x19   :  { %243 = dma.done.wait [#allocation3], 256  }
  0x1a   :  { %244 = vsyncadd [#allocation3], 4294967040 }
  0x1b   :  { %245 = dma.done.wait [#allocation6], 512  }
  0x1c   :  { %246 = vsyncadd [#allocation6], 4294966784  ;;  %vm56_vm0 = vcmask 261120   ;;  %v48_v0 = vld [vmem:[#allocation5 + $0x18] sm:$0xff]  ;;  %v47_v1 = vld [vmem:[#allocation5 + $0x10] sm:$0xff]  ;;  %s253_s24 = smov [#allocation7]  }
  0x1d   :  { %167 = vmatprep.subr.mxu0 %v48_v0  ;;  %v43_v2 = vld [vmem:[#allocation2] sm:$0xff]  ;;  %v46_v3 = vld [vmem:[#allocation5 + $0x8] sm:$0xff]  ;;  %v45_v4 = vld [vmem:[#allocation5] sm:$0xff]  ;;  %s145_s25 = sshll.u32 %s253_s24, 4  ;;  %s146_s25 = int_to_ptr.vmem [resolvable:$true] %s145_s25 }
  0x1e   :  { %168 = vmatpush3.msra.mxu0 %v48_v0  ;;  %175 = vmatprep.mubr.msk.f32.mxu0 %vm56_vm0, %v43_v2  ;;  %v44_v5 = vld [vmem:[#allocation2 + $0x8] sm:$0xff]  ;;  %v158_v6 = vld [vmem:[%s301_s2] ss:$0 sm:$0xff]  ;;  %s223_s26 = scalar_lea.vmem %s146_s25, 256  ;;  %p228_p11 = scmp.lt.s32.totalorder %s146_s25, %s146_s25 }
  0x1f   :  { %169 = vmatprep.subr.mxu0 %v47_v1  ;;  %p224_p10 = scmp.ne.s32.totalorder %s146_s25, %s223_s26  ;;  %p229_p12 = scmp.lt.s32.totalorder %s223_s26, %s223_s26 }
  0x20   :  { %170 = vmatpush3.msra.mxu0 %v47_v1 }
  0x21   :  { %171 = vmatprep.subr.mxu0 %v46_v3  ;;  %p230_p13 = por %p229_p12, %p228_p11 }
  0x22   :  { %172 = vmatpush3.msra.mxu0 %v46_v3 }
  0x23   :  { %173 = vmatprep.subr.mxu0 %v45_v4  ;;  %p231_p0 = pnand %p230_p13, %p224_p10 }
  0x24   :  { %174 = vmatpush3.msra.mxu0 %v45_v4 }
  0x25   :  { %176 = vmatmul.mubr.msk.f32.vlgmr.msra.gmra.mxu0 %vm56_vm0, %v44_v5 }
  0xe5   :  { %v177_v7 = vpop.f32.mrf.mxu0 }
  0xe6   :  { %v135_v8 = vadd.f32 %v177_v7, %v158_v6 }
  0xe7   :  { %v129_v9 = vpop.f32.mrf.mxu0 }
  0xe8   :  { %139 = vst.msk [vmem:[#allocation7 + $0x8] sm:$0xff] %vm56_vm0, %v135_v8  ;;  %v130_v10 = vadd.f32 %v158_v6, %v129_v9 }
  0xea   :  { %138 = vst.msk [vmem:[#allocation7] sm:$0xff] %vm56_vm0, %v130_v10 }
  0xeb   :  { %234 = shalt.err (!%p231_p0)
}
  0xec   :  { %151 = dma.vmem_to_hbm [thread:$0]  %s146_s25, 256, %s302_s3, [#allocation4], %s250_s15, %s250_s15, %s251_s16  }
  0xed   :  { %247 = dma.done.wait [#allocation4], 256  }
  0xee   :  { %248 = vsyncadd [#allocation4], 4294967040 }
  0xef   :  { %155 = vsyncpa [#allocation3], 1 }
  0xf0   :  { %156 = vsyncpa [#allocation6], 1 }
  0xf1   :  { %157 = vsyncpa [#allocation4], 1 }

</bundles_post_ra>
